<compile_context>
chip_gen: v7x
topology: tpu7x:2x2x1
jax: 0.10.0
libtpu: 0.0.40
codegen_flags: <defaults>
</compile_context>

<pallas_src>
import functools

import jax
import jax.numpy as jnp
from jax.experimental import pallas as pl
from jax.experimental.pallas import tpu as pltpu


K_IN = 784          # real input features
K_PAD = 896         # 784 padded up to a multiple of 128
H1 = 128
H2 = 64
N_CLASSES = 10
N_PAD = 128         # lane-dense padded class dim


def _round_up(x, m):
    return ((x + m - 1) // m) * m


def mlp_kernel(x_ref, w1_ref, b1_ref, w2_ref, b2_ref, w3_ref, b3_ref, o_ref):
    # fc1 + ReLU  (bf16 x bf16 -> f32 accumulate)
    h1 = jnp.dot(x_ref[...], w1_ref[...], preferred_element_type=jnp.float32)
    h1 = jnp.maximum(h1 + b1_ref[...], 0.0).astype(jnp.bfloat16)
    # fc2 + ReLU
    h2 = jnp.dot(h1, w2_ref[...], preferred_element_type=jnp.float32)
    h2 = jnp.maximum(h2 + b2_ref[...], 0.0).astype(jnp.bfloat16)
    # fc3 (padded to 128 lane-dense classes; padded biases are -1e30)
    logits = jnp.dot(h2, w3_ref[...], preferred_element_type=jnp.float32)
    logits = logits + b3_ref[...]
    # numerically stable softmax over the (padded) class axis; padded classes
    # exp() to exactly 0 so the real 10 classes are normalized correctly.
    m = jnp.max(logits, axis=-1, keepdims=True)
    e = jnp.exp(logits - m)
    denom = jnp.sum(e, axis=-1, keepdims=True)
    o_ref[...] = (e / denom).astype(o_ref.dtype)


@functools.partial(jax.jit, static_argnames=("tb",))
def network_3_forward(x, params, tb=None):
    """x: (B, 784) f32/bf16.  params: (w1,b1,w2,b2,w3,b3) with W as (in,out)."""
    w1, b1, w2, b2, w3, b3 = params
    B = x.shape[0]

    # Batch tile: >=256 rows fills the v6e/v7x MXU along M; multiple of 8 for
    # the (8, 128) sublane constraint.  Small batches use one small tile.
    if tb is None:
        tb = 512 if B >= 512 else _round_up(B, 8)
    B_pad = _round_up(B, tb)

    # ---- pad + cast in the wrapper (trace-time plumbing, outside the kernel) ----
    x_p = jnp.zeros((B_pad, K_PAD), jnp.bfloat16)
    x_p = x_p.at[:B, :K_IN].set(x.astype(jnp.bfloat16))
    w1_p = jnp.zeros((K_PAD, H1), jnp.bfloat16).at[:K_IN, :].set(w1.astype(jnp.bfloat16))
    w2_b = w2.astype(jnp.bfloat16)
    w3_p = jnp.zeros((H2, N_PAD), jnp.bfloat16).at[:, :N_CLASSES].set(w3.astype(jnp.bfloat16))
    b1_f = b1.astype(jnp.float32)
    b2_f = b2.astype(jnp.float32)
    # Large negative *finite* bias for padded classes (avoids inf-inf NaNs).
    b3_p = jnp.full((1, N_PAD), -1e30, jnp.float32).at[:, :N_CLASSES].set(
        b3.astype(jnp.float32))

    grid = (B_pad // tb,)

    cost = pl.CostEstimate(
        flops=2 * B_pad * (K_PAD * H1 + H1 * H2 + H2 * N_PAD),
        transcendentals=B_pad * N_PAD,
        bytes_accessed=(B_pad * K_PAD * 2                      # x (bf16)
                        + (K_PAD * H1 + H1 * H2 + H2 * N_PAD) * 2   # weights (bf16)
                        + (H1 + H2 + N_PAD) * 4                # biases (f32)
                        + B_pad * N_PAD * 4),                  # output (f32)
    )

    out = pl.pallas_call(
        mlp_kernel,
        out_shape=jax.ShapeDtypeStruct((B_pad, N_PAD), jnp.float32),
        grid_spec=pltpu.PrefetchScalarGridSpec(
            num_scalar_prefetch=0,
            grid=grid,
            in_specs=[
                pl.BlockSpec((tb, K_PAD), lambda i: (i, 0)),    # x tile (pipelined)
                pl.BlockSpec((K_PAD, H1), lambda i: (0, 0)),    # w1 (resident)
                pl.BlockSpec((1, H1), lambda i: (0, 0)),        # b1
                pl.BlockSpec((H1, H2), lambda i: (0, 0)),       # w2
                pl.BlockSpec((1, H2), lambda i: (0, 0)),        # b2
                pl.BlockSpec((H2, N_PAD), lambda i: (0, 0)),    # w3 (padded)
                pl.BlockSpec((1, N_PAD), lambda i: (0, 0)),     # b3 (padded)
            ],
            out_specs=pl.BlockSpec((tb, N_PAD), lambda i: (i, 0)),
        ),
        compiler_params=pltpu.CompilerParams(
            dimension_semantics=("parallel",),  # shard batch tiles across v7x TCs
        ),
        cost_estimate=cost,
    )(x_p, w1_p, b1_f, w2_b, b2_f, w3_p, b3_p)

    return out[:B, :N_CLASSES]


def init_params(key):
    """Deterministic init matching PyTorch Linear shapes (stored as (in, out))."""
    def linear(key, fan_in, fan_out):
        kw, kb = jax.random.split(key)
        bound = 1.0 / jnp.sqrt(fan_in)
        w = jax.random.uniform(kw, (fan_in, fan_out), jnp.float32, -bound, bound)
        b = jax.random.uniform(kb, (1, fan_out), jnp.float32, -bound, bound)
        return w, b

    k1, k2, k3 = jax.random.split(key, 3)
    w1, b1 = linear(k1, K_IN, H1)
    w2, b2 = linear(k2, H1, H2)
    w3, b3 = linear(k3, H2, N_CLASSES)
    return (w1, b1, w2, b2, w3, b3)


if __name__ == "__main__":
    key = jax.random.PRNGKey(0)
    k_params, k_x = jax.random.split(key)
    params = init_params(k_params)

    B = 8  # small batch for the smoke test
    x = jax.random.normal(k_x, (B, K_IN), jnp.float32)

    out = network_3_forward(x, params)
    out = jax.block_until_ready(out)

    # Reference using the same bf16-weight / f32-accumulate recipe as the kernel.
    w1, b1, w2, b2, w3, b3 = params
    xb = x.astype(jnp.bfloat16)
    h = jnp.maximum(jnp.dot(xb, w1.astype(jnp.bfloat16),
                            preferred_element_type=jnp.float32) + b1, 0.0)
    h = jnp.maximum(jnp.dot(h.astype(jnp.bfloat16), w2.astype(jnp.bfloat16),
                            preferred_element_type=jnp.float32) + b2, 0.0)
    logits = jnp.dot(h.astype(jnp.bfloat16), w3.astype(jnp.bfloat16),
                     preferred_element_type=jnp.float32) + b3
    ref = jax.nn.softmax(logits, axis=1)

    # Full-precision f32 reference (loose check: bf16 weights perturb it slightly).
    h32 = jnp.maximum(x @ w1 + b1, 0.0)
    h32 = jnp.maximum(h32 @ w2 + b2, 0.0)
    ref32 = jax.nn.softmax(h32 @ w3 + b3, axis=1)

    assert out.shape == (B, N_CLASSES)
    assert jnp.allclose(out, ref, atol=2e-3), "mismatch vs bf16-matched reference"
    assert jnp.allclose(out, ref32, atol=5e-2), "mismatch vs f32 reference"
    assert jnp.allclose(jnp.sum(out, axis=1), 1.0, atol=1e-5)

    print("KERNEL_OK")
</pallas_src>

<mosaic_0001>
module attributes {stable_mosaic.version = 11 : i64} {
  func.func @mlp_kernel(%arg0: i32, %arg1: memref<8x896xbf16, #tpu.memory_space<vmem>>, %arg2: memref<896x128xbf16, #tpu.memory_space<vmem>>, %arg3: memref<1x128xf32, #tpu.memory_space<vmem>>, %arg4: memref<128x64xbf16, #tpu.memory_space<vmem>>, %arg5: memref<1x64xf32, #tpu.memory_space<vmem>>, %arg6: memref<64x128xbf16, #tpu.memory_space<vmem>>, %arg7: memref<1x128xf32, #tpu.memory_space<vmem>>, %arg8: memref<8x128xf32, #tpu.memory_space<vmem>>) attributes {dimension_semantics = [#tpu.dimension_semantics<parallel>], iteration_bounds = array<i64: 1>, scalar_prefetch = 0 : i64, scratch_operands = 0 : i64, tpu.core_type = #tpu.core_type<tc>, window_params = [{transform_indices = @transform_0, window_bounds = array<i64: 8, 896>}, {pipeline_mode = #tpu.pipeline_mode<synchronous>, transform_indices = @transform_1, window_bounds = array<i64: 896, 128>}, {pipeline_mode = #tpu.pipeline_mode<synchronous>, transform_indices = @transform_2, window_bounds = array<i64: 1, 128>}, {pipeline_mode = #tpu.pipeline_mode<synchronous>, transform_indices = @transform_3, window_bounds = array<i64: 128, 64>}, {pipeline_mode = #tpu.pipeline_mode<synchronous>, transform_indices = @transform_4, window_bounds = array<i64: 1, 64>}, {pipeline_mode = #tpu.pipeline_mode<synchronous>, transform_indices = @transform_5, window_bounds = array<i64: 64, 128>}, {pipeline_mode = #tpu.pipeline_mode<synchronous>, transform_indices = @transform_6, window_bounds = array<i64: 1, 128>}, {transform_indices = @transform_7, window_bounds = array<i64: 8, 128>}]} {
    %c0 = arith.constant 0 : index
    %c0_0 = arith.constant 0 : index
    %0 = vector.load %arg1[%c0, %c0_0] : memref<8x896xbf16, #tpu.memory_space<vmem>>, vector<8x896xbf16>
    %c0_1 = arith.constant 0 : index
    %c0_2 = arith.constant 0 : index
    %1 = vector.load %arg2[%c0_1, %c0_2] : memref<896x128xbf16, #tpu.memory_space<vmem>>, vector<896x128xbf16>
    %cst = arith.constant dense<0.000000e+00> : vector<8x128xf32>
    %2 = tpu.matmul %0, %1, %cst {dimension_numbers = #tpu.dot_dimension_numbers<[1], [0], [0], [1], [0, 0, 1, 1], [], []>} : vector<8x896xbf16>, vector<896x128xbf16>, vector<8x128xf32> -> vector<8x128xf32>
    %c0_3 = arith.constant 0 : index
    %c0_4 = arith.constant 0 : index
    %3 = vector.load %arg3[%c0_3, %c0_4] : memref<1x128xf32, #tpu.memory_space<vmem>>, vector<1x128xf32>
    %4 = vector.broadcast %3 : vector<1x128xf32> to vector<8x128xf32>
    %5 = arith.addf %2, %4 : vector<8x128xf32>
    %cst_5 = arith.constant 0.000000e+00 : f32
    %6 = vector.broadcast %cst_5 : f32 to vector<8x128xf32>
    %7 = arith.maximumf %5, %6 : vector<8x128xf32>
    %8 = arith.truncf %7 : vector<8x128xf32> to vector<8x128xbf16>
    %c0_6 = arith.constant 0 : index
    %c0_7 = arith.constant 0 : index
    %9 = vector.load %arg4[%c0_6, %c0_7] : memref<128x64xbf16, #tpu.memory_space<vmem>>, vector<128x64xbf16>
    %cst_8 = arith.constant dense<0.000000e+00> : vector<8x64xf32>
    %10 = tpu.matmul %8, %9, %cst_8 {dimension_numbers = #tpu.dot_dimension_numbers<[1], [0], [0], [1], [0, 0, 1, 1], [], []>} : vector<8x128xbf16>, vector<128x64xbf16>, vector<8x64xf32> -> vector<8x64xf32>
    %c0_9 = arith.constant 0 : index
    %c0_10 = arith.constant 0 : index
    %11 = vector.load %arg5[%c0_9, %c0_10] : memref<1x64xf32, #tpu.memory_space<vmem>>, vector<1x64xf32>
    %12 = vector.broadcast %11 : vector<1x64xf32> to vector<8x64xf32>
    %13 = arith.addf %10, %12 : vector<8x64xf32>
    %cst_11 = arith.constant 0.000000e+00 : f32
    %14 = vector.broadcast %cst_11 : f32 to vector<8x64xf32>
    %15 = arith.maximumf %13, %14 : vector<8x64xf32>
    %16 = arith.truncf %15 : vector<8x64xf32> to vector<8x64xbf16>
    %c0_12 = arith.constant 0 : index
    %c0_13 = arith.constant 0 : index
    %17 = vector.load %arg6[%c0_12, %c0_13] : memref<64x128xbf16, #tpu.memory_space<vmem>>, vector<64x128xbf16>
    %cst_14 = arith.constant dense<0.000000e+00> : vector<8x128xf32>
    %18 = tpu.matmul %16, %17, %cst_14 {dimension_numbers = #tpu.dot_dimension_numbers<[1], [0], [0], [1], [0, 0, 1, 1], [], []>} : vector<8x64xbf16>, vector<64x128xbf16>, vector<8x128xf32> -> vector<8x128xf32>
    %c0_15 = arith.constant 0 : index
    %c0_16 = arith.constant 0 : index
    %19 = vector.load %arg7[%c0_15, %c0_16] : memref<1x128xf32, #tpu.memory_space<vmem>>, vector<1x128xf32>
    %20 = vector.broadcast %19 : vector<1x128xf32> to vector<8x128xf32>
    %21 = arith.addf %18, %20 : vector<8x128xf32>
    %cst_17 = arith.constant dense<0xFF800000> : vector<8xf32>
    %22 = vector.multi_reduction <maximumf>, %21, %cst_17 [1] : vector<8x128xf32> to vector<8xf32>
    %23 = vector.shape_cast %22 : vector<8xf32> to vector<8x1xf32>
    %24 = vector.broadcast %23 : vector<8x1xf32> to vector<8x128xf32>
    %25 = arith.subf %21, %24 : vector<8x128xf32>
    %26 = math.exp %25 : vector<8x128xf32>
    %cst_18 = arith.constant dense<0.000000e+00> : vector<8xf32>
    %27 = vector.multi_reduction <add>, %26, %cst_18 [1] : vector<8x128xf32> to vector<8xf32>
    %28 = vector.shape_cast %27 : vector<8xf32> to vector<8x1xf32>
    %29 = vector.broadcast %28 : vector<8x1xf32> to vector<8x128xf32>
    %30 = arith.divf %26, %29 : vector<8x128xf32>
    %c0_19 = arith.constant 0 : index
    %c0_20 = arith.constant 0 : index
    %31 = vector.load %arg8[%c0_19, %c0_20] : memref<8x128xf32, #tpu.memory_space<vmem>>, vector<8x128xf32>
    tpu.vector_store %arg8[%c0_19, %c0_20], %30 {strides = array<i32>} : memref<8x128xf32, #tpu.memory_space<vmem>>, vector<8x128xf32>,
    return
  }
  func.func @transform_0(%arg0: i32) -> (i32, i32) {
    %c0_i32 = arith.constant 0 : i32
    %c0_i32_0 = arith.constant 0 : i32
    return %arg0, %c0_i32 : i32, i32
  }
  func.func @transform_1(%arg0: i32) -> (i32, i32) {
    %c0_i32 = arith.constant 0 : i32
    %c0_i32_0 = arith.constant 0 : i32
    %c0_i32_1 = arith.constant 0 : i32
    return %c0_i32, %c0_i32_0 : i32, i32
  }
  func.func @transform_2(%arg0: i32) -> (i32, i32) {
    %c0_i32 = arith.constant 0 : i32
    %c0_i32_0 = arith.constant 0 : i32
    %c0_i32_1 = arith.constant 0 : i32
    return %c0_i32, %c0_i32_0 : i32, i32
  }
  func.func @transform_3(%arg0: i32) -> (i32, i32) {
    %c0_i32 = arith.constant 0 : i32
    %c0_i32_0 = arith.constant 0 : i32
    %c0_i32_1 = arith.constant 0 : i32
    return %c0_i32, %c0_i32_0 : i32, i32
  }
  func.func @transform_4(%arg0: i32) -> (i32, i32) {
    %c0_i32 = arith.constant 0 : i32
    %c0_i32_0 = arith.constant 0 : i32
    %c0_i32_1 = arith.constant 0 : i32
    return %c0_i32, %c0_i32_0 : i32, i32
  }
  func.func @transform_5(%arg0: i32) -> (i32, i32) {
    %c0_i32 = arith.constant 0 : i32
    %c0_i32_0 = arith.constant 0 : i32
    %c0_i32_1 = arith.constant 0 : i32
    return %c0_i32, %c0_i32_0 : i32, i32
  }
  func.func @transform_6(%arg0: i32) -> (i32, i32) {
    %c0_i32 = arith.constant 0 : i32
    %c0_i32_0 = arith.constant 0 : i32
    %c0_i32_1 = arith.constant 0 : i32
    return %c0_i32, %c0_i32_0 : i32, i32
  }
  func.func @transform_7(%arg0: i32) -> (i32, i32) {
    %c0_i32 = arith.constant 0 : i32
    %c0_i32_0 = arith.constant 0 : i32
    return %arg0, %c0_i32 : i32, i32
  }
}

</mosaic_0001>

<bundles_post_ra>
// kernel: network_3_forward.1
= control target key start
LH: loop header
LB: loop body
LE: loop exit
PB: predicated region body
PF: predicated region fallthrough
CT: control target
= control target key end

     0   :  { %v1220_v42 = vmov 0.0   ;;  %vm1221_vm0 = vmmov 0   ;;  %s1526_s0 = inlined_call_operand.vmem [shape: bf16[8,896], index: 0, kind: input, shape index: {}]   ;;  %s1527_s1 = inlined_call_operand.vmem [shape: bf16[896,128], index: 1, kind: input, shape index: {}]   ;;  %s1528_s2 = inlined_call_operand.vmem [shape: f32[1,128], index: 2, kind: input, shape index: {}]   ;;  %s1529_s3 = inlined_call_operand.vmem [shape: bf16[128,64], index: 3, kind: input, shape index: {}]   ;;  %s1530_s4 = inlined_call_operand.vmem [shape: f32[1,64], index: 4, kind: input, shape index: {}]   ;;  %s1531_s5 = inlined_call_operand.vmem [shape: bf16[64,128], index: 5, kind: input, shape index: {}]   ;;  %s1532_s6 = inlined_call_operand.vmem [shape: f32[1,128], index: 6, kind: input, shape index: {}]   ;;  %s1533_s7 = inlined_call_operand.hbm [shape: f32[8,128], index: 7, kind: output, shape index: {}]  }
   0x1   :  { %v1117_v0 = vld [vmem:[%s1527_s1 + $0x40] sm:$0xff]   ;;  %v1121_v4 = vld [vmem:[%s1527_s1 + $0x48] sm:$0xff]   ;;  %v1125_v8 = vld [vmem:[%s1527_s1 + $0x50] sm:$0xff]  }
   0x2   :  { %v1118_v1 = vld [vmem:[%s1527_s1] sm:$0xff]   ;;  %973 = vmatprep.subr.bf16.mxu0 %v1117_v0  ;;  %v1122_v5 = vld [vmem:[%s1527_s1 + $0x8] sm:$0xff]   ;;  %v1126_v9 = vld [vmem:[%s1527_s1 + $0x10] sm:$0xff]  }
   0x3   :  { %v1119_v2 = vld [vmem:[%s1527_s1 + $0xc0] sm:$0xff]   ;;  %974 = vmatpush3.bf16.msra.mxu0 %v1118_v1  ;;  %v1123_v6 = vld [vmem:[%s1527_s1 + $0xc8] sm:$0xff]   ;;  %v1127_v10 = vld [vmem:[%s1527_s1 + $0xd0] sm:$0xff]  }
   0x4   :  { %v1120_v3 = vld [vmem:[%s1527_s1 + $0x80] sm:$0xff]   ;;  %995 = vmatprep.subr.bf16.mxu1 %v1119_v2  ;;  %975 = vmatprep.subr.bf16.mxu0 %v1121_v4  ;;  %v1124_v7 = vld [vmem:[%s1527_s1 + $0x88] sm:$0xff]   ;;  %v1128_v11 = vld [vmem:[%s1527_s1 + $0x90] sm:$0xff]  }
   0x5   :  { %996 = vmatpush3.bf16.msra.mxu1 %v1120_v3  ;;  %v1129_v12 = vld [vmem:[%s1527_s1 + $0x58] sm:$0xff]   ;;  %v1133_v16 = vld [vmem:[%s1527_s1 + $0x60] sm:$0xff]   ;;  %v1137_v20 = vld [vmem:[%s1527_s1 + $0x68] sm:$0xff]  }
   0x6   :  { %997 = vmatprep.subr.bf16.mxu1 %v1123_v6  ;;  %v1130_v13 = vld [vmem:[%s1527_s1 + $0x18] sm:$0xff]   ;;  %v1134_v17 = vld [vmem:[%s1527_s1 + $0x20] sm:$0xff]   ;;  %v1138_v21 = vld [vmem:[%s1527_s1 + $0x28] sm:$0xff]  }
   0x7   :  { %976 = vmatpush3.bf16.msra.mxu0 %v1122_v5  ;;  %v1131_v14 = vld [vmem:[%s1527_s1 + $0xd8] sm:$0xff]   ;;  %v1135_v18 = vld [vmem:[%s1527_s1 + $0xe0] sm:$0xff]   ;;  %v1139_v22 = vld [vmem:[%s1527_s1 + $0xe8] sm:$0xff]  }
   0x8   :  { %977 = vmatprep.subr.bf16.mxu0 %v1125_v8  ;;  %v1132_v15 = vld [vmem:[%s1527_s1 + $0x98] sm:$0xff]   ;;  %v1136_v19 = vld [vmem:[%s1527_s1 + $0xa0] sm:$0xff]   ;;  %v1140_v23 = vld [vmem:[%s1527_s1 + $0xa8] sm:$0xff]  }
   0x9   :  { %998 = vmatpush3.bf16.msra.mxu1 %v1124_v7  ;;  %v1141_v24 = vld [vmem:[%s1527_s1 + $0x70] sm:$0xff]   ;;  %v1145_v28 = vld [vmem:[%s1527_s1 + $0x78] sm:$0xff]   ;;  %v28_v31 = vld [vmem:[%s1526_s0] sm:$0xff] }
   0xa   :  { %999 = vmatprep.subr.bf16.mxu1 %v1127_v10  ;;  %v1142_v25 = vld [vmem:[%s1527_s1 + $0x30] sm:$0xff]   ;;  %v1146_v29 = vld [vmem:[%s1527_s1 + $0x38] sm:$0xff]   ;;  %v895_v32 = vcombine.low %v28_v31, %v28_v31  ;;  %v896_v33 = vcombine.high %v28_v31, %v28_v31  ;;  %v1151_v35 = vld [vmem:[%s1527_s1 + $0x140] sm:$0xff]  }
   0xb   :  { %978 = vmatpush3.bf16.msra.mxu0 %v1126_v9  ;;  %v1143_v26 = vld [vmem:[%s1527_s1 + $0xf0] sm:$0xff]   ;;  %v1147_v30 = vld [vmem:[%s1527_s1 + $0xf8] sm:$0xff]   ;;  %v29_v36 = vld [vmem:[%s1526_s0 + $0x8] sm:$0xff] }
   0xc   :  { %979 = vmatprep.subr.bf16.mxu0 %v1129_v12  ;;  %v1144_v27 = vld [vmem:[%s1527_s1 + $0xb0] sm:$0xff]   ;;  %v1150_v34 = vld [vmem:[%s1527_s1 + $0xb8] sm:$0xff]   ;;  %544 = vmatprep.mubr.bf16.mxu0 %v896_v33  ;;  %v897_v37 = vcombine.low %v29_v36, %v29_v36  ;;  %v898_v38 = vcombine.high %v29_v36, %v29_v36  ;;  %v1154_v39 = vld [vmem:[%s1527_s1 + $0x100] sm:$0xff]  }
   0xd   :  { %1000 = vmatpush3.bf16.msra.mxu1 %v1128_v11  ;;  %v1155_v40 = vld [vmem:[%s1527_s1 + $0x180] sm:$0xff]   ;;  %v1156_v41 = vld [vmem:[%s1527_s1 + $0x148] sm:$0xff]   ;;  %v1159_v45 = vld [vmem:[%s1527_s1 + $0x150] sm:$0xff]  }
   0xe   :  { %1001 = vmatprep.subr.bf16.mxu1 %v1131_v14  ;;  %584 = vmatprep.mubr.bf16.mxu1 %v898_v38  ;;  %v1157_v43 = vld [vmem:[%s1527_s1 + $0x108] sm:$0xff]   ;;  %v1160_v46 = vld [vmem:[%s1527_s1 + $0x110] sm:$0xff]   ;;  %v1162_v48 = vld [vmem:[%s1527_s1 + $0x158] sm:$0xff]  }
   0xf   :  { %980 = vmatpush3.bf16.msra.mxu0 %v1130_v13  ;;  %v1158_v44 = vld [vmem:[%s1527_s1 + $0x188] sm:$0xff]   ;;  %v1161_v47 = vld [vmem:[%s1527_s1 + $0x190] sm:$0xff]   ;;  %v1163_v49 = vld [vmem:[%s1527_s1 + $0x118] sm:$0xff]  }
  0x10   :  { %981 = vmatprep.subr.bf16.mxu0 %v1133_v16  ;;  %v1165_v50 = vld [vmem:[%s1527_s1 + $0x160] sm:$0xff]   ;;  %v1164_v51 = vld [vmem:[%s1527_s1 + $0x198] sm:$0xff]   ;;  %v1168_v53 = vld [vmem:[%s1527_s1 + $0x168] sm:$0xff]  }
  0x11   :  { %1002 = vmatpush3.bf16.msra.mxu1 %v1132_v15  ;;  %v1166_v52 = vld [vmem:[%s1527_s1 + $0x120] sm:$0xff]   ;;  %v1169_v55 = vld [vmem:[%s1527_s1 + $0x128] sm:$0xff]   ;;  %v1171_v56 = vld [vmem:[%s1527_s1 + $0x170] sm:$0xff]  }
  0x12   :  { %1003 = vmatprep.subr.bf16.mxu1 %v1135_v18  ;;  %v1167_v54 = vld [vmem:[%s1527_s1 + $0x1a0] sm:$0xff]   ;;  %v1170_v57 = vld [vmem:[%s1527_s1 + $0x1a8] sm:$0xff]   ;;  %v1172_v58 = vld [vmem:[%s1527_s1 + $0x130] sm:$0xff]  }
  0x13   :  { %982 = vmatpush3.bf16.msra.mxu0 %v1134_v17  ;;  %v30_v59 = vld [vmem:[%s1526_s0 + $0x10] sm:$0xff]  ;;  %v1174_v62 = vld [vmem:[%s1527_s1 + $0x178] sm:$0xff]  }
  0x14   :  { %983 = vmatprep.subr.bf16.mxu0 %v1137_v20  ;;  %v1173_v60 = vld [vmem:[%s1527_s1 + $0x1b0] sm:$0xff]   ;;  %v900_v61 = vcombine.high %v30_v59, %v30_v59  ;;  %v1175_v63 = vld [vmem:[%s1527_s1 + $0x138] sm:$0xff]   ;;  %v899_v1 = vcombine.low %v30_v59, %v30_v59 }
  0x15   :  { %1004 = vmatpush3.bf16.msra.mxu1 %v1136_v19  ;;  %v1178_v0 = vld [vmem:[%s1527_s1 + $0x1b8] sm:$0xff]  }
  0x16   :  { %1005 = vmatprep.subr.bf16.mxu1 %v1139_v22  ;;  %v1179_v2 = vld [vmem:[%s1526_s0 + $0x18] ss:$0 sps:$4 sm:$0xff]  }
  0x17   :  { %984 = vmatpush3.bf16.msra.mxu0 %v1138_v21 }
  0x18   :  { %985 = vmatprep.subr.bf16.mxu0 %v1141_v24 }
  0x19   :  { %1006 = vmatpush3.bf16.msra.mxu1 %v1140_v23 }
  0x1a   :  { %1007 = vmatprep.subr.bf16.mxu1 %v1143_v26 }
  0x1b   :  { %986 = vmatpush3.bf16.msra.mxu0 %v1142_v25 }
  0x1c   :  { %987 = vmatprep.subr.bf16.mxu0 %v1145_v28 }
  0x1d   :  { %1008 = vmatpush3.bf16.msra.mxu1 %v1144_v27 }
  0x1e   :  { %1009 = vmatprep.subr.bf16.mxu1 %v1147_v30 }
  0x1f   :  { %988 = vmatpush3.bf16.msra.mxu0 %v1146_v29 }
  0x20   :  { %1017 = vmatprep.subr.bf16.mxu0 %v1151_v35 }
  0x21   :  { %1010 = vmatpush3.bf16.msra.mxu1 %v1150_v34 }
  0x22   :  { %545 = vmatmul.mubr.bf16.vlgmr.msra.gmra.mrb[0].mxu0 %v895_v32  ;;  %1062 = vmatprep.subr.bf16.mxu1 %v1220_v42 }
  0x23   :  { %1018 = vmatpush3.bf16.msra.mxu0 %v1154_v39  ;;  %624 = vmatprep.mubr.bf16.mxu0 %v900_v61 }
  0x24   :  { %585 = vmatmul.mubr.bf16.vlgmr.msra.gmra.mrb[0].mxu1 %v897_v37  ;;  %1019 = vmatprep.subr.bf16.mxu0 %v1156_v41 }
  0x25   :  { %1063 = vmatpush3.bf16.msra.mxu1 %v1155_v40  ;;  %1078 = vmatprep.mubr.msk.bf16.mxu1 %vm1221_vm0, %v1220_v42 }
  0x26   :  { %1064 = vmatprep.subr.bf16.mxu1 %v1220_v42 }
  0x27   :  { %1020 = vmatpush3.bf16.msra.mxu0 %v1157_v43 }
  0x28   :  { %1021 = vmatprep.subr.bf16.mxu0 %v1159_v45 }
  0x29   :  { %1065 = vmatpush3.bf16.msra.mxu1 %v1158_v44 }
  0x2a   :  { %1066 = vmatprep.subr.bf16.mxu1 %v1220_v42 }
  0x2b   :  { %1022 = vmatpush3.bf16.msra.mxu0 %v1160_v46 }
  0x2c   :  { %1023 = vmatprep.subr.bf16.mxu0 %v1162_v48 }
  0x2d   :  { %1067 = vmatpush3.bf16.msra.mxu1 %v1161_v47 }
  0x2e   :  { %1068 = vmatprep.subr.bf16.mxu1 %v1220_v42 }
  0x2f   :  { %1024 = vmatpush3.bf16.msra.mxu0 %v1163_v49 }
  0x30   :  { %1025 = vmatprep.subr.bf16.mxu0 %v1165_v50 }
  0x31   :  { %1069 = vmatpush3.bf16.msra.mxu1 %v1164_v51 }
  0x32   :  { %1070 = vmatprep.subr.bf16.mxu1 %v1220_v42 }
  0x33   :  { %1026 = vmatpush3.bf16.msra.mxu0 %v1166_v52 }
  0x34   :  { %1027 = vmatprep.subr.bf16.mxu0 %v1168_v53 }
  0x35   :  { %1071 = vmatpush3.bf16.msra.mxu1 %v1167_v54 }
  0x36   :  { %1072 = vmatprep.subr.bf16.mxu1 %v1220_v42 }
  0x37   :  { %1028 = vmatpush3.bf16.msra.mxu0 %v1169_v55 }
  0x38   :  { %1029 = vmatprep.subr.bf16.mxu0 %v1171_v56 }
  0x39   :  { %1073 = vmatpush3.bf16.msra.mxu1 %v1170_v57 }
  0x3a   :  { %1074 = vmatprep.subr.bf16.mxu1 %v1220_v42 }
  0x3b   :  { %1030 = vmatpush3.bf16.msra.mxu0 %v1172_v58 }
  0x3c   :  { %1031 = vmatprep.subr.bf16.mxu0 %v1174_v62 }
  0x3d   :  { %1075 = vmatpush3.bf16.msra.mxu1 %v1173_v60 }
  0x3e   :  { %1076 = vmatprep.subr.bf16.mxu1 %v1220_v42 }
  0x3f   :  { %1032 = vmatpush3.bf16.msra.mxu0 %v1175_v63 }
  0x40   :  { %1082 = vmatprep.subr.bf16.mxu0 %v1220_v42 }
  0x41   :  { %12 = vsyncpa [#allocation3], 0  ;;  %1077 = vmatpush3.bf16.msra.mxu1 %v1178_v0  ;;  %v1180_v3 = vld [vmem:[%s1529_s3] sm:$0xff]   ;;  %v1181_v4 = vld [vmem:[%s1529_s3 + $0x8] sm:$0xff]   ;;  %vm826_vm1 = vcmask 523264  }
  0x42   :  { %625 = vmatmul.mubr.bf16.vlgmr.msra.gmra.mrb[4].mxu0 %v899_v1  ;;  %1102 = vmatprep.subr.bf16.mxu1 %v1220_v42  ;;  %v1182_v5 = vld [vmem:[%s1529_s3 + $0x10] sm:$0xff]   ;;  %v1183_v6 = vld [vmem:[%s1529_s3 + $0x18] sm:$0xff]   ;;  %v1184_v7 = vld [vmem:[%s1529_s3 + $0x20] sm:$0xff]  }
  0x43   :  { %1098 = vmatprep.mubr.msk.bf16.mxu0 %vm1221_vm0, %v1220_v42  ;;  %1083 = vmatpush3.bf16.msra.mxu0 %v1180_v3  ;;  %v1185_v8 = vld [vmem:[%s1529_s3 + $0x28] sm:$0xff]   ;;  %v1186_v9 = vld [vmem:[%s1529_s3 + $0x30] sm:$0xff]   ;;  %v1187_v10 = vld [vmem:[%s1529_s3 + $0x38] sm:$0xff]  }
  0x44   :  { %1079 = vmatmul.mubr.bf16.vlgmr.msra.gmra.mrb[4].mxu1 %v1179_v2  ;;  %1084 = vmatprep.subr.bf16.mxu0 %v1220_v42  ;;  %v1188_v11 = vld [vmem:[%s1531_s5] sm:$0xff]   ;;  %v1189_v12 = vld [vmem:[%s1531_s5 + $0x8] sm:$0xff]   ;;  %v1190_v39 = vld [vmem:[%s1531_s5 + $0x10] sm:$0xff]  }
  0x45   :  { %1110 = vmatprep.mubr.msk.bf16.mxu1 %vm1221_vm0, %v1220_v42  ;;  %1103 = vmatpush3.bf16.msra.mxu1 %v1188_v11  ;;  %v894_v14 = vld [vmem:[%s1528_s2] ss:$0 sm:$0xff]  ;;  %v1191_v40 = vld [vmem:[%s1531_s5 + $0x18] sm:$0xff]  }
  0x46   :  { %1104 = vmatprep.subr.bf16.mxu1 %v1220_v42  ;;  %v958_v41 = vld [vmem:[%s1530_s4] ss:$0 sm:$0xff]  ;;  %s1222_s4 = smov [#allocation2]  }
  0x47   :  { %1085 = vmatpush3.bf16.msra.mxu0 %v1181_v4  ;;  %s886_s5 = sshll.u32 %s1222_s4, 4  ;;  %s887_s5 = int_to_ptr.vmem [resolvable:$true] %s886_s5 }
  0x48   :  { %1086 = vmatprep.subr.bf16.mxu0 %v1220_v42  ;;  %p1201_p1 = scmp.lt.s32.totalorder %s887_s5, %s887_s5 }
  0x49   :  { %1105 = vmatpush3.bf16.msra.mxu1 %v1189_v12 }
  0x4a   :  { %1106 = vmatprep.subr.bf16.mxu1 %v1220_v42 }
  0x4b   :  { %1087 = vmatpush3.bf16.msra.mxu0 %v1182_v5 }
  0x4c   :  { %1088 = vmatprep.subr.bf16.mxu0 %v1220_v42 }
  0x4d   :  { %1107 = vmatpush3.bf16.msra.mxu1 %v1190_v39 }
  0x4e   :  { %1108 = vmatprep.subr.bf16.mxu1 %v1220_v42 }
  0x4f   :  { %1089 = vmatpush3.bf16.msra.mxu0 %v1183_v6 }
  0x50   :  { %1090 = vmatprep.subr.bf16.mxu0 %v1220_v42 }
  0x51   :  { %1109 = vmatpush3.bf16.msra.mxu1 %v1191_v40 }
  0x53   :  { %1091 = vmatpush3.bf16.msra.mxu0 %v1184_v7 }
  0x54   :  { %1092 = vmatprep.subr.bf16.mxu0 %v1220_v42 }
  0x57   :  { %1093 = vmatpush3.bf16.msra.mxu0 %v1185_v8 }
  0x58   :  { %1094 = vmatprep.subr.bf16.mxu0 %v1220_v42 }
  0x5b   :  { %1095 = vmatpush3.bf16.msra.mxu0 %v1186_v9 }
  0x5c   :  { %1096 = vmatprep.subr.bf16.mxu0 %v1220_v42  ;;  %v967_v42 = vld [vmem:[%s1532_s6] ss:$0 sm:$0xff]  ;;  %s1196_s6 = scalar_lea.vmem %s887_s5, 128 }
  0x5d   :  { %p1197_p0 = scmp.ne.s32.totalorder %s887_s5, %s1196_s6  ;;  %p1202_p2 = scmp.lt.s32.totalorder %s1196_s6, %s1196_s6 }
  0x5f   :  { %1097 = vmatpush3.bf16.msra.mxu0 %v1187_v10  ;;  %p1203_p3 = por %p1202_p2, %p1201_p1 }
  0x61   :  { %p1204_p4 = pnand %p1203_p3, %p1197_p0 }
  0xf5   :  { %v989_v13 = vpop.f32.mrb[0].mxu0 }
  0xf6   :  { %v990_v15 = vpop.f32.mrb[1].mxu0 }
  0xf7   :  { %v991_v16 = vadd.f32 %v990_v15, %v989_v13  ;;  %v992_v17 = vpop.f32.mrb[2].mxu0  ;;  %v1011_v18 = vpop.f32.mrb[0].mxu1 }
  0xf8   :  { %v993_v19 = vpop.f32.mrb[3].mxu0  ;;  %v1012_v20 = vpop.f32.mrb[1].mxu1 }
  0xf9   :  { %v547_v21 = vadd.f32 %v991_v16, %v894_v14  ;;  %v1013_v22 = vadd.f32 %v1012_v20, %v1011_v18  ;;  %v1014_v23 = vpop.f32.mrb[2].mxu1 }
  0xfa   :  { %v1015_v24 = vpop.f32.mrb[3].mxu1 }
  0xfb   :  { %v587_v25 = vadd.f32 %v1013_v22, %v547_v21 }
 0x115   :  { %v1033_v26 = vpop.f32.mrb[4].mxu0 }
 0x116   :  { %v1034_v27 = vpop.f32.mrb[5].mxu0 }
 0x117   :  { %v1035_v28 = vadd.f32 %v1034_v27, %v1033_v26  ;;  %v1036_v29 = vpop.f32.mrb[6].mxu0  ;;  %v666_v30 = vpop.f32.mrb[4].mxu1 }
 0x118   :  { %v1037_v31 = vpop.f32.mrb[7].mxu0  ;;  %v1080_v32 = vpop.f32.mrb[5].mxu1 }
 0x119   :  { %v627_v33 = vadd.f32 %v1035_v28, %v587_v25  ;;  %v669_v34 = vpop.f32.mrb[6].mxu1 }
 0x11a   :  { %v1081_v35 = vpop.f32.mrb[7].mxu1 }
 0x11b   :  { %v667_v36 = vadd.f32 %v666_v30, %v627_v33 }
 0x11d   :  { %v672_v37 = vmax.f32 %v667_v36, 0.0 }
 0x11f   :  { %v673_v38 = vpack.c.bf16 %v672_v37, %v672_v37 }
 0x121   :  { %1099 = vmatmul.mubr.bf16.vlgmr.msra.gmra.mrb[8].mxu0 %v673_v38 }
 0x1f4   :  { %v779_v43 = vpop.f32.mrb[8].mxu0 }
 0x1f5   :  { %v780_v44 = vadd.f32 %v958_v41, %v779_v43  ;;  %v1100_v45 = vpop.f32.mrb[9].mxu0 }
 0x1f6   :  { %v782_v46 = vpop.f32.mrb[10].mxu0 }
 0x1f7   :  { %v785_v47 = vmax.f32 %v780_v44, 0.0  ;;  %v1101_v48 = vpop.f32.mrb[11].mxu0 }
 0x1f9   :  { %v786_v49 = vpack.c.bf16 %v785_v47, %v785_v47 }
 0x1fb   :  { %1111 = vmatmul.mubr.msk.bf16.vlgmr.msra.gmra.mrb[8].mxu1 %vm826_vm1, %v786_v49 }
 0x2ce   :  { %v864_v50 = vpop.f32.mrb[8].mxu1 }
 0x2cf   :  { %v865_v51 = vadd.f32 %v967_v42, %v864_v50  ;;  %v1112_v52 = vpop.f32.mrb[9].mxu1 }
 0x2d0   :  { %v867_v53 = vpop.f32.mrb[10].mxu1 }
 0x2d1   :  { %870 = vmax.xlane.f32.xlu0 %v865_v51  ;;  %v1113_v54 = vpop.f32.mrb[11].mxu1 }
 0x35e   :  { %v871_v55 = vpop.xlane.xlu0 %870 }
 0x35f   :  { %v872_v56 = vsub.f32 %v865_v51, %v871_v55 }
 0x361   :  { %v873_v57 = vmul.f32 1.442695, %v872_v56 }
 0x363   :  { %1192 = vpow2.f32 %v873_v57 }
 0x36d   :  { %v1193_v58 = vpop.eup %1192 }
 0x36e   :  { %875 = vadd.xlane.f32.xlu0 %v1193_v58 }
 0x3fb   :  { %v876_v59 = vpop.xlane.xlu0 %875 }
 0x3fc   :  { %1194 = vrcp.f32 %v876_v59 }
 0x406   :  { %v1195_v60 = vpop.eup %1194 }
 0x407   :  { %v878_v61 = vmul.f32 %v1195_v60, %v1193_v58 }
 0x409   :  { %879 = vst [vmem:[#allocation2] sm:$0xff] %v878_v61 }
 0x40a   :  { %1207 = shalt.err (!%p1204_p4)
}
 0x40b   :  { %s1208_s9 = scalar_lea.hbm %s1533_s7, 128 }
 0x40c   :  { %p1209_p5 = scmp.ne.s32.totalorder %s1533_s7, %s1208_s9  ;;  %p1212_p6 = scmp.lt.u32.totalorder %s1208_s9, %s1533_s7 }
 0x40e   :  { %p1214_p7 = pnand %p1212_p6, %p1209_p5 }
 0x410   :  { %1217 = shalt.err (!%p1214_p7)
}
 0x411   :  { %889 = dma.vmem_to_hbm [thread:$0]  %s887_s5, 128, %s1533_s7, [#allocation3]  }
 0x412   :  { %1218 = dma.done.wait [#allocation3], 128  }
 0x413   :  { %1219 = vsyncadd [#allocation3], 4294967168 }
 0x414   :  { %893 = vsyncpa [#allocation3], 1 }

</bundles_post_ra>
